<compile_context>
chip_gen: v6e
topology: v6e:2x2x1
jax: 0.10.0
libtpu: 0.0.40
codegen_flags: <defaults>
</compile_context>

<pallas_src>
import functools

import jax
import jax.numpy as jnp
from jax.experimental import pallas as pl
from jax.experimental.pallas import tpu as pltpu


def _round_up(x, m):
    return (x + m - 1) // m * m


def _choose_tn(N, tn_target=2048):
    """Lane-dense column tile: multiple of 128, clamped to the problem."""
    return min(tn_target, _round_up(N, 128))


def _decoder_kernel(x_ref, w_ref, b_ref, o_ref):
    """One (tm, tn) output tile of  X @ W_pad + b.

    x_ref: (tm, H)   bf16 activation row-tile i (fetched once per i, reused
                     across the whole j axis since its block index is constant
                     along the inner grid dimension)
    w_ref: (H, tn)   bf16 decoder-weight column tile j
    b_ref: (Nt, tn)  f32 bias, fully resident in VMEM across the grid
    o_ref: (tm, tn)  output tile (i, j); f32 MXU accumulate, cast on store
    """
    j = pl.program_id(1)
    acc = jnp.dot(x_ref[...], w_ref[...], preferred_element_type=jnp.float32)
    b_tile = b_ref[pl.ds(j, 1), :]                 # (1, tn) bias row for tile j
    o_ref[...] = (acc + b_tile).astype(o_ref.dtype)


@functools.partial(jax.jit, static_argnames=("tm", "out_dtype", "w_buffers"))
def dense_decoder(x, w_t_pad, b_pad, *, tm=512, out_dtype=jnp.bfloat16,
                  w_buffers=2):
    """Pallas tiled matmul: (M, H) @ (H, Np) + bias -> (M, Np).

    w_t_pad: (H, Np) bf16, Np a multiple of the column tile (pre-padded once).
    b_pad  : (Nt, tn) f32 bias reshaped into column tiles (Nt * tn == Np).
    """
    M, H = x.shape
    H2, Np = w_t_pad.shape
    Nt, tn = b_pad.shape
    assert H == H2, (H, H2)
    assert Nt * tn == Np, (Nt, tn, Np)

    # Row tile: big enough to stream W as few times as possible, rounded to 16
    # for bf16 sublane packing.  Only the (small) activation is padded per call.
    tm = min(tm, _round_up(M, 16))
    Mp = _round_up(M, tm)
    xp = x if Mp == M else jnp.pad(x, ((0, Mp - M), (0, 0)))

    n_row_tiles = Mp // tm
    out_itemsize = jnp.dtype(out_dtype).itemsize
    cost = pl.CostEstimate(
        flops=2 * Mp * H * Np,
        transcendentals=0,
        bytes_accessed=(Mp * H * xp.dtype.itemsize                 # X once
                        + n_row_tiles * H * Np * w_t_pad.dtype.itemsize  # W re-streamed
                        + Np * b_pad.dtype.itemsize                # bias once
                        + Mp * Np * out_itemsize),                 # output
    )

    if w_buffers == 2:
        w_spec = pl.BlockSpec((H, tn), lambda i, j: (0, j))
    else:  # sweep knob: deeper W pipelining if traces show exposed DMA waits
        w_spec = pl.BlockSpec((H, tn), lambda i, j: (0, j),
                              pipeline_mode=pl.Buffered(w_buffers))

    out = pl.pallas_call(
        _decoder_kernel,
        out_shape=jax.ShapeDtypeStruct((Mp, Np), out_dtype),
        grid_spec=pltpu.PrefetchScalarGridSpec(
            num_scalar_prefetch=0,
            grid=(n_row_tiles, Np // tn),
            in_specs=[
                pl.BlockSpec((tm, H), lambda i, j: (i, 0)),   # X row tile i
                w_spec,                                        # W^T column tile j
                pl.BlockSpec((Nt, tn), lambda i, j: (0, 0)),   # bias, resident
            ],
            out_specs=pl.BlockSpec((tm, tn), lambda i, j: (i, j)),
        ),
        compiler_params=pltpu.CompilerParams(
            dimension_semantics=("parallel", "parallel"),
            vmem_limit_bytes=32 * 1024 * 1024,
        ),
        cost_estimate=cost,
    )(xp, w_t_pad, b_pad)

    return out[:M] if Mp != M else out


def prepare_params(emb_f32, w_f32, b_f32, *, tn_target=2048):
    """One-time (outside the jitted per-call path) parameter preparation.

    emb_f32: (num_items, H) f32, row 0 zeroed (padding_idx=0)
    w_f32  : (num_items, H) f32  (PyTorch nn.Linear weight layout)
    b_f32  : (num_items,)   f32
    Returns bf16 embedding table, bf16 transposed+padded weight (H, Np),
    f32 bias reshaped to (Np // tn, tn).
    """
    N, H = w_f32.shape
    tn = _choose_tn(N, tn_target)
    Np = _round_up(N, tn)
    w_t = jnp.pad(w_f32.T, ((0, 0), (0, Np - N))).astype(jnp.bfloat16)
    b_p = jnp.pad(b_f32, (0, Np - N)).astype(jnp.float32).reshape(Np // tn, tn)
    emb = emb_f32.astype(jnp.bfloat16)
    return emb, w_t, b_p


@functools.partial(jax.jit, static_argnames=("num_items", "out_dtype", "tm"))
def base_model_forward(item_ids, emb_table, dec_w_t_pad, dec_b_pad, *,
                       num_items, out_dtype=jnp.bfloat16, tm=512):
    """Full forward: embedding lookup (encode) + Pallas dense decoder.

    item_ids   : (B, T) int32
    emb_table  : (num_items, H) bf16, row 0 all-zero (padding_idx=0)
    dec_w_t_pad: (H, Np) bf16
    dec_b_pad  : (Np//tn, tn) f32
    returns    : (B, T, num_items) out_dtype
    """
    B, T = item_ids.shape

    # encode(): embedding lookup with padding_idx=0 (row 0 of the table is 0).
    # TODO(synk): could be fused into the Pallas call via scalar prefetch.
    encoded = jnp.take(emb_table, item_ids.reshape(-1), axis=0)   # (B*T, H) bf16

    decoded = dense_decoder(encoded, dec_w_t_pad, dec_b_pad,
                            tm=tm, out_dtype=out_dtype)            # (B*T, Np)
    return decoded[:, :num_items].reshape(B, T, num_items)


if __name__ == "__main__":
    num_items = 256
    hidden_dim = 64
    B, T = 2, 8

    key = jax.random.PRNGKey(0)
    k_emb, k_w, k_b, k_ids = jax.random.split(key, 4)

    # PyTorch-style f32 init.
    # nn.Embedding(num_items, H, padding_idx=0): N(0,1), row 0 zeroed.
    emb_f32 = jax.random.normal(k_emb, (num_items, hidden_dim), jnp.float32)
    emb_f32 = emb_f32.at[0].set(0.0)
    # nn.Linear(H, num_items): U(-1/sqrt(H), 1/sqrt(H)).
    bound = 1.0 / jnp.sqrt(jnp.float32(hidden_dim))
    w_f32 = jax.random.uniform(k_w, (num_items, hidden_dim), jnp.float32,
                               -bound, bound)
    b_f32 = jax.random.uniform(k_b, (num_items,), jnp.float32, -bound, bound)

    # One-time preparation (transpose / pad / cast) outside the hot path.
    emb_table, dec_w_t, dec_b = prepare_params(emb_f32, w_f32, b_f32)

    # Item-id sequences (0 = padding index).
    item_ids = jax.random.randint(k_ids, (B, T), 0, num_items, dtype=jnp.int32)

    out = base_model_forward(item_ids, emb_table, dec_w_t, dec_b,
                             num_items=num_items)
    out = jax.block_until_ready(out)

    assert out.shape == (B, T, num_items), out.shape
    assert out.dtype == jnp.bfloat16, out.dtype

    # Sanity check against a plain-JAX reference using the same bf16 params
    # (f32 accumulation on both sides; tolerance covers the bf16 logit cast).
    x_ref = jnp.take(emb_table, item_ids.reshape(-1), 0).astype(jnp.float32)
    w_ref = w_f32.T.astype(jnp.bfloat16).astype(jnp.float32)
    ref = (x_ref @ w_ref + b_f32).reshape(B, T, num_items)
    err = float(jnp.max(jnp.abs(out.astype(jnp.float32) - ref)))
    assert err < 5e-2, err

    print("KERNEL_OK")
</pallas_src>

<mosaic_0001>
module attributes {stable_mosaic.version = 11 : i64} {
  func.func @_decoder_kernel(%arg0: i32, %arg1: i32, %arg2: memref<16x64xbf16, #tpu.memory_space<vmem>>, %arg3: memref<64x256xbf16, #tpu.memory_space<vmem>>, %arg4: memref<1x256xf32, #tpu.memory_space<vmem>>, %arg5: memref<16x256xbf16, #tpu.memory_space<vmem>>) attributes {dimension_semantics = [#tpu.dimension_semantics<parallel>, #tpu.dimension_semantics<parallel>], iteration_bounds = array<i64: 1, 1>, scalar_prefetch = 0 : i64, scratch_operands = 0 : i64, tpu.core_type = #tpu.core_type<tc>, window_params = [{transform_indices = @transform_0, window_bounds = array<i64: 16, 64>}, {transform_indices = @transform_1, window_bounds = array<i64: 64, 256>}, {pipeline_mode = #tpu.pipeline_mode<synchronous>, transform_indices = @transform_2, window_bounds = array<i64: 1, 256>}, {transform_indices = @transform_3, window_bounds = array<i64: 16, 256>}]} {
    %c0 = arith.constant 0 : index
    %c0_0 = arith.constant 0 : index
    %0 = vector.load %arg2[%c0, %c0_0] : memref<16x64xbf16, #tpu.memory_space<vmem>>, vector<16x64xbf16>
    %c0_1 = arith.constant 0 : index
    %c0_2 = arith.constant 0 : index
    %1 = vector.load %arg3[%c0_1, %c0_2] : memref<64x256xbf16, #tpu.memory_space<vmem>>, vector<64x256xbf16>
    %cst = arith.constant dense<0.000000e+00> : vector<16x256xf32>
    %2 = tpu.matmul %0, %1, %cst {dimension_numbers = #tpu.dot_dimension_numbers<[1], [0], [0], [1], [0, 0, 1, 1], [], []>} : vector<16x64xbf16>, vector<64x256xbf16>, vector<16x256xf32> -> vector<16x256xf32>
    %3 = arith.index_cast %arg1 : i32 to index
    %c0_3 = arith.constant 0 : index
    %4 = vector.load %arg4[%3, %c0_3] : memref<1x256xf32, #tpu.memory_space<vmem>>, vector<1x256xf32>
    %5 = vector.broadcast %4 : vector<1x256xf32> to vector<16x256xf32>
    %6 = arith.addf %2, %5 : vector<16x256xf32>
    %7 = arith.truncf %6 : vector<16x256xf32> to vector<16x256xbf16>
    %c0_4 = arith.constant 0 : index
    %c0_5 = arith.constant 0 : index
    %8 = vector.load %arg5[%c0_4, %c0_5] : memref<16x256xbf16, #tpu.memory_space<vmem>>, vector<16x256xbf16>
    tpu.vector_store %arg5[%c0_4, %c0_5], %7 {strides = array<i32>} : memref<16x256xbf16, #tpu.memory_space<vmem>>, vector<16x256xbf16>,
    return
  }
  func.func @transform_0(%arg0: i32, %arg1: i32) -> (i32, i32) {
    %c0_i32 = arith.constant 0 : i32
    %c0_i32_0 = arith.constant 0 : i32
    return %arg0, %c0_i32 : i32, i32
  }
  func.func @transform_1(%arg0: i32, %arg1: i32) -> (i32, i32) {
    %c0_i32 = arith.constant 0 : i32
    %c0_i32_0 = arith.constant 0 : i32
    return %c0_i32, %arg1 : i32, i32
  }
  func.func @transform_2(%arg0: i32, %arg1: i32) -> (i32, i32) {
    %c0_i32 = arith.constant 0 : i32
    %c0_i32_0 = arith.constant 0 : i32
    %c0_i32_1 = arith.constant 0 : i32
    return %c0_i32, %c0_i32_0 : i32, i32
  }
  func.func @transform_3(%arg0: i32, %arg1: i32) -> (i32, i32) {
    %c0_i32 = arith.constant 0 : i32
    return %arg0, %arg1 : i32, i32
  }
}

</mosaic_0001>

<bundles_post_ra>
// kernel: dense_decoder.1
= control target key start
LH: loop header
LB: loop body
LE: loop exit
PB: predicated region body
PF: predicated region fallthrough
CT: control target
= control target key end

     0   :  { %8 = vsyncpa [#allocation3], 0  ;;  %s339_s0 = inlined_call_operand.hbm [shape: bf16[16,64], index: 0, kind: input, shape index: {}]   ;;  %s340_s1 = inlined_call_operand.hbm [shape: bf16[64,256], index: 1, kind: input, shape index: {}]   ;;  %s341_s2 = inlined_call_operand.vmem [shape: f32[1,256], index: 2, kind: input, shape index: {}]   ;;  %s342_s3 = inlined_call_operand.hbm [shape: bf16[16,256], index: 3, kind: output, shape index: {}]  }
   0x1   :  { %9 = vsyncpa [#allocation6], 0 }
   0x2   :  { %10 = vsyncpa [#allocation4], 0  ;;  %s293_s12 = smov [#allocation2]  }
   0x3   :  { %s16_s13 = sshll.u32 %s293_s12, 4  ;;  %s17_s13 = int_to_ptr.vmem [resolvable:$true] %s16_s13 }
   0x4   :  { %s235_s14 = scalar_lea.vmem %s17_s13, 128  ;;  %p240_p1 = scmp.lt.s32.totalorder %s17_s13, %s17_s13 }
   0x5   :  { %p236_p0 = scmp.ne.s32.totalorder %s17_s13, %s235_s14  ;;  %p241_p2 = scmp.lt.s32.totalorder %s235_s14, %s235_s14 }
   0x7   :  { %p242_p3 = por %p241_p2, %p240_p1 }
   0x9   :  { %p243_p4 = pnand %p242_p3, %p236_p0 }
   0xb   :  { %246 = shalt.err (!%p243_p4)
}
   0xc   :  { %s294_s15 = smov 64   ;;  %s295_s16 = smov 4  }
   0xd   :  { %22 = dma.hbm_to_vmem [thread:$0]  %s339_s0, 128, %s17_s13, [#allocation3], %s294_s15, %s294_s15, %s295_s16  }
   0xe   :  { %s296_s19 = smov [#allocation5]  }
   0xf   :  { %s28_s20 = sshll.u32 %s296_s19, 4  ;;  %s29_s20 = int_to_ptr.vmem [resolvable:$true] %s28_s20 }
  0x10   :  { %s255_s21 = scalar_lea.vmem %s29_s20, 1024  ;;  %p260_p6 = scmp.lt.s32.totalorder %s29_s20, %s29_s20 }
  0x11   :  { %p256_p5 = scmp.ne.s32.totalorder %s29_s20, %s255_s21  ;;  %p261_p7 = scmp.lt.s32.totalorder %s255_s21, %s255_s21 }
  0x13   :  { %p262_p8 = por %p261_p7, %p260_p6 }
  0x15   :  { %p263_p9 = pnand %p262_p8, %p256_p5 }
  0x17   :  { %266 = shalt.err (!%p263_p9)
}
  0x18   :  { %s297_s22 = smov 128   ;;  %s298_s23 = smov 8  }
  0x19   :  { %34 = dma.hbm_to_vmem [thread:$0]  %s340_s1, 1024, %s29_s20, [#allocation6], %s297_s22, %s297_s22, %s298_s23  }
  0x1a   :  { %287 = dma.done.wait [#allocation3], 128  }
  0x1b   :  { %288 = vsyncadd [#allocation3], 4294967168 }
  0x1c   :  { %289 = dma.done.wait [#allocation6], 1024  }
  0x1d   :  { %290 = vsyncadd [#allocation6], 4294966272  ;;  %v299_v0 = vmov 0   ;;  %v214_v1 = vld [vmem:[#allocation5 + $0x34] ss:$8 sps:$4 sm:$0xff]   ;;  %vm113_vm0 = vcmask 523264   ;;  %v58_v10 = vlaneseq }
  0x1e   :  { %149 = vmatprep.mubr.bf16.mxu0 %v299_v0  ;;  %v216_v2 = vld [vmem:[#allocation5 + $0x30] ss:$8 sps:$4 sm:$0xff]   ;;  %125 = vmatprep.subr.bf16.mxu0 %v214_v1  ;;  %v217_v3 = vld [vmem:[#allocation5 + $0x24] ss:$8 sps:$4 sm:$0xff]   ;;  %v219_v4 = vld [vmem:[#allocation5 + $0x20] ss:$8 sps:$4 sm:$0xff]  }
  0x1f   :  { %126 = vmatpush1.bf16.msra.mxu0 %v216_v2  ;;  %v220_v5 = vld [vmem:[#allocation5 + $0x14] ss:$8 sps:$4 sm:$0xff]   ;;  %v222_v6 = vld [vmem:[#allocation5 + $0x10] ss:$8 sps:$4 sm:$0xff]   ;;  %v223_v7 = vld [vmem:[#allocation5 + $0x4] ss:$8 sps:$4 sm:$0xff]  }
  0x20   :  { %127 = vmatprep.subr.bf16.mxu0 %v217_v3  ;;  %v225_v8 = vld [vmem:[#allocation5] ss:$8 sps:$4 sm:$0xff]   ;;  %v226_v9 = vld [vmem:[#allocation2] sm:$0xff]   ;;  %v59_v11 = vshrl.u32 %v58_v10, 7  ;;  %s300_s26 = smov [#allocation7]  }
  0x21   :  { %v56_v14 = vld [vmem:[%s341_s2] sm:$0x3]  ;;  %s179_s27 = sshll.u32 %s300_s26, 4  ;;  %s180_s27 = int_to_ptr.vmem [resolvable:$true] %s179_s27 }
  0x22   :  { %v60_v12 = vsub.s32 0, %v59_v11  ;;  %v64_v13 = vsub.s32 1, %v59_v11  ;;  %s267_s28 = scalar_lea.vmem %s180_s27, 256  ;;  %p272_p11 = scmp.lt.s32.totalorder %s180_s27, %s180_s27 }
  0x23   :  { %128 = vmatpush1.bf16.msra.mxu0 %v219_v4  ;;  %p268_p10 = scmp.ne.s32.totalorder %s180_s27, %s267_s28  ;;  %p273_p12 = scmp.lt.s32.totalorder %s267_s28, %s267_s28 }
  0x24   :  { %129 = vmatprep.subr.bf16.mxu0 %v220_v5  ;;  %v61_v15 = vrot.slane %v56_v14, %v60_v12  ;;  %v65_v16 = vrot.slane %v56_v14, %v64_v13 }
  0x25   :  { %p274_p13 = por %p273_p12, %p272_p11 }
  0x27   :  { %130 = vmatpush1.bf16.msra.mxu0 %v222_v6  ;;  %p275_p0 = pnand %p274_p13, %p268_p10 }
  0x28   :  { %131 = vmatprep.subr.bf16.mxu0 %v223_v7 }
  0x2b   :  { %132 = vmatpush1.bf16.msra.mxu0 %v225_v8 }
  0x2e   :  { %201 = vmatmul.mubr.msk.bf16.vlgmr.msra.gmra.mxu0 %vm113_vm0, %v226_v9 }
  0xee   :  { %v151_v17 = vpop.f32.mrf.mxu0 }
  0xef   :  { %v152_v19 = vadd.f32 %v151_v17, %v61_v15 }
  0xf0   :  { %v153_v18 = vpop.f32.mrf.mxu0 }
  0xf1   :  { %v154_v20 = vadd.f32 %v153_v18, %v65_v16 }
  0xf2   :  { %v155_v21 = vpop.f32.mrf.mxu0 }
  0xf3   :  { %v204_v22 = vpack.c.bf16 %v154_v20, %v152_v19  ;;  %v156_v24 = vadd.f32 %v155_v21, %v61_v15 }
  0xf4   :  { %v157_v23 = vpop.f32.mrf.mxu0 }
  0xf5   :  { %172 = vst [vmem:[#allocation7] sm:$0xff] %v204_v22  ;;  %v158_v25 = vadd.f32 %v157_v23, %v65_v16 }
  0xf7   :  { %v205_v26 = vpack.c.bf16 %v158_v25, %v156_v24 }
  0xf9   :  { %173 = vst [vmem:[#allocation7 + $0x8] sm:$0xff] %v205_v26 }
  0xfa   :  { %278 = shalt.err (!%p275_p0)
}
  0xfb   :  { %185 = dma.vmem_to_hbm [thread:$0]  %s180_s27, 256, %s342_s3, [#allocation4], %s297_s22, %s297_s22, %s298_s23  }
  0xfc   :  { %291 = dma.done.wait [#allocation4], 256  }
  0xfd   :  { %292 = vsyncadd [#allocation4], 4294967040 }
  0xfe   :  { %189 = vsyncpa [#allocation3], 1 }
  0xff   :  { %190 = vsyncpa [#allocation6], 1 }
 0x100   :  { %191 = vsyncpa [#allocation4], 1 }

</bundles_post_ra>
